<compile_context>
chip_gen: v5e
topology: v5e:2x2
jax: 0.10.0
libtpu: 0.0.40
codegen_flags: <defaults>
</compile_context>

<pallas_src>
import functools

import jax
import jax.numpy as jnp
import numpy as np
from jax import lax
from jax.experimental import pallas as pl
from jax.experimental.pallas import tpu as pltpu


def _gather_rows_dma_kernel(src_ref, x_hbm, o_hbm, sems, *, nring, rows_per_step):
    """Copies o[:, g, :] = x[:, src_ref[g], :] for this grid step's range of g.

    x_hbm / o_hbm are raw (N, G, row) HBM refs; every copy is one strided HBM->HBM DMA
    (N runs of `row` contiguous elements).  Up to `nring` DMAs are kept in flight.
    """
    num_rows = o_hbm.shape[1]
    lo = pl.program_id(0) * rows_per_step
    hi = jnp.minimum(num_rows, lo + rows_per_step)

    def _copy(g, slot):
        return pltpu.make_async_copy(
            x_hbm.at[:, pl.ds(src_ref[g], 1), :],
            o_hbm.at[:, pl.ds(g, 1), :],
            sems.at[slot],
        )

    def _issue(g, carry):
        j = g - lo
        slot = j % nring

        @pl.when(j >= nring)
        def _():
            # Ring slot is being reused: wait for the copy issued `nring` iterations ago.
            _copy(g - nring, slot).wait()

        _copy(g, slot).start()
        return carry

    lax.fori_loop(lo, hi, _issue, 0)

    def _drain(g, carry):
        _copy(g, (g - lo) % nring).wait()
        return carry

    # Wait for the up-to-nring copies still in flight.
    lax.fori_loop(jnp.maximum(lo, hi - nring), hi, _drain, 0)


def _gather_rows_hbm(x_view, src_rows):
    """out[:, g, :] = x_view[:, src_rows[g], :] via direct HBM->HBM DMAs."""
    N, G, row = x_view.shape
    nsplit = 2 if G >= 2 else 1           # >= 2 grid steps so v7x's two TCs both get work
    rows_per_step = -(-G // nsplit)       # static ceil-div
    nring = max(1, min(8, rows_per_step))

    kernel = functools.partial(
        _gather_rows_dma_kernel, nring=nring, rows_per_step=rows_per_step)

    return pl.pallas_call(
        kernel,
        out_shape=jax.ShapeDtypeStruct((N, G, row), x_view.dtype),
        grid_spec=pltpu.PrefetchScalarGridSpec(
            num_scalar_prefetch=1,                            # src_rows -> SMEM
            grid=(nsplit,),
            in_specs=[pl.BlockSpec(memory_space=pl.ANY)],     # raw HBM ref, no auto-DMA
            out_specs=pl.BlockSpec(memory_space=pl.ANY),
            scratch_shapes=[pltpu.SemaphoreType.DMA((nring,))],
        ),
        compiler_params=pltpu.CompilerParams(
            # Each grid step writes a disjoint set of output rows -> parallel-safe
            # (lets v7x shard the DMA loop across its two TensorCores).
            dimension_semantics=("parallel",),
        ),
        cost_estimate=pl.CostEstimate(
            flops=0,
            transcendentals=0,
            bytes_accessed=int(2 * x_view.size * x_view.dtype.itemsize),
        ),
    )(src_rows, x_view)


def make_shuffle_indices(key, dim_len, group):
    """Replicates BrokenBlock.getShuffle index construction (deterministically).

    indices[g*group + j] == perm[g]*group + j: contiguous runs of `group` channels move
    together, exactly what torch.randperm + cat produces.
    """
    assert dim_len % group == 0
    perm = jax.random.permutation(key, dim_len // group)
    idx = perm[:, None] * group + jnp.arange(group)[None, :]
    return idx.reshape(dim_len).astype(jnp.int32)


def broken_block_forward(x_nchw, indices, group, *, training=True):
    """Forward pass of BrokenBlock.

    training=True : out[n, c, h, w] = x[n, indices[c], h, w]   (torch.gather along dim=1)
    training=False: identity.
    """
    if not training:
        return x_nchw

    N, C, H, W = x_nchw.shape
    HW = H * W

    # Fast path: verify on the host that the indices really are group-contiguous
    # (perm[g]*group + j), as getShuffle produces.  If so, one DMA moves a whole group.
    use_group_path = False
    src_host = None
    if group > 1 and C % group == 0:
        try:
            idx_host = np.asarray(jax.device_get(indices)).astype(np.int64)
            blocks = idx_host.reshape(C // group, group)
            expect = (blocks[:, :1] // group) * group + np.arange(group)[None, :]
            if np.array_equal(blocks, expect):
                use_group_path = True
                src_host = (blocks[:, 0] // group).astype(np.int32)
        except Exception:   # indices is a tracer -> use the general per-channel path
            use_group_path = False

    if use_group_path:
        G, row = C // group, group * HW
        src_rows = jnp.asarray(src_host)
    else:
        # General gather: every channel is its own row (correct for arbitrary indices).
        G, row = C, HW
        src_rows = jnp.asarray(indices, dtype=jnp.int32)

    # Free, metadata-only reshape of the contiguous NCHW buffer (no transpose).
    x_view = x_nchw.reshape(N, G, row)
    out_view = _gather_rows_hbm(x_view, src_rows)
    return out_view.reshape(N, C, H, W)


if __name__ == "__main__":
    key = jax.random.PRNGKey(0)

    # (N, C, H, W, group): group-contiguous fast path with lane-aligned rows, a small-row
    # group path, and the module's default group=1 (exercises the per-channel path).
    configs = [
        (2, 32, 16, 16, 8),
        (2, 12, 8, 8, 3),
        (2, 16, 8, 8, 1),
    ]

    for i, (N, C, H, W, group) in enumerate(configs):
        k_x, k_p = jax.random.split(jax.random.fold_in(key, i))
        x = jax.random.normal(k_x, (N, C, H, W), dtype=jnp.float32)
        indices = make_shuffle_indices(k_p, C, group)

        out = jax.block_until_ready(
            broken_block_forward(x, indices, group, training=True))
        # torch.gather(x, 1, idx_expanded) == x[:, indices, :, :]
        ref = x[:, indices, :, :]
        np.testing.assert_array_equal(np.asarray(out), np.asarray(ref))

        out_eval = jax.block_until_ready(
            broken_block_forward(x, indices, group, training=False))
        np.testing.assert_array_equal(np.asarray(out_eval), np.asarray(x))

    print("KERNEL_OK")
</pallas_src>

<mosaic_0001>
module attributes {stable_mosaic.version = 11 : i64} {
  func.func @_gather_rows_dma_kernel(%arg0: i32, %arg1: memref<4xi32, #tpu.memory_space<smem>>, %arg2: memref<2x4x2048xf32, #tpu.memory_space<any>>, %arg3: memref<2x4x2048xf32, #tpu.memory_space<any>>, %arg4: memref<2x!tpu.dma_semaphore, #tpu.memory_space<semaphore_mem>>) attributes {dimension_semantics = [#tpu.dimension_semantics<parallel>], iteration_bounds = array<i64: 2>, scalar_prefetch = 1 : i64, scratch_operands = 1 : i64, tpu.core_type = #tpu.core_type<tc>, window_params = [{}, {}]} {
    %c2_i32 = arith.constant 2 : i32
    %0 = arith.muli %arg0, %c2_i32 : i32
    %c2_i32_0 = arith.constant 2 : i32
    %1 = arith.addi %0, %c2_i32_0 : i32
    %c4_i32 = arith.constant 4 : i32
    %2 = arith.minsi %c4_i32, %1 : i32
    %c0_i32 = arith.constant 0 : i32
    %3 = arith.subi %2, %0 : i32
    %4 = arith.addi %0, %3 : i32
    %c1_i32 = arith.constant 1 : i32
    scf.for %arg5 = %0 to %4 step %c1_i32  : i32 {
      %9 = arith.subi %arg5, %0 : i32
      %c2_i32_4 = arith.constant 2 : i32
      %c0_i32_5 = arith.constant 0 : i32
      %10 = arith.cmpi eq, %c2_i32_4, %c0_i32_5 : i32
      %c1_i32_6 = arith.constant 1 : i32
      %11 = arith.select %10, %c1_i32_6, %c2_i32_4 : i32
      %12 = arith.remsi %9, %11 : i32
      %c0_i32_7 = arith.constant 0 : i32
      %13 = arith.cmpi ne, %12, %c0_i32_7 : i32
      %c0_i32_8 = arith.constant 0 : i32
      %14 = arith.cmpi slt, %12, %c0_i32_8 : i32
      %c0_i32_9 = arith.constant 0 : i32
      %15 = arith.cmpi slt, %11, %c0_i32_9 : i32
      %16 = arith.xori %14, %15 : i1
      %17 = arith.andi %16, %13 : i1
      %18 = arith.addi %12, %11 : i32
      %19 = arith.select %17, %18, %12 : i32
      %c2_i32_10 = arith.constant 2 : i32
      %20 = arith.cmpi sge, %9, %c2_i32_10 : i32
      %21 = arith.extui %20 : i1 to i32
      %c0_i32_11 = arith.constant 0 : i32
      %22 = arith.cmpi ne, %21, %c0_i32_11 : i32
      scf.if %22 {
        %c2_i32_16 = arith.constant 2 : i32
        %29 = arith.subi %arg5, %c2_i32_16 : i32
        %30 = arith.index_cast %29 : i32 to index
        %31 = memref.load %arg1[%30] : memref<4xi32, #tpu.memory_space<smem>>
        %c0_i32_17 = arith.constant 0 : i32
        %c0_i32_18 = arith.constant 0 : i32
        %32 = tpu.memref_slice %arg2[%c0_i32_17, %31, %c0_i32_18] : memref<2x4x2048xf32, #tpu.memory_space<any>> -> memref<2x1x2048xf32, #tpu.memory_space<any>>
        %c0_i32_19 = arith.constant 0 : i32
        %c0_i32_20 = arith.constant 0 : i32
        %33 = tpu.memref_slice %arg3[%c0_i32_19, %29, %c0_i32_20] : memref<2x4x2048xf32, #tpu.memory_space<any>> -> memref<2x1x2048xf32, #tpu.memory_space<any>>
        %34 = tpu.memref_slice %arg4[%19] : memref<2x!tpu.dma_semaphore, #tpu.memory_space<semaphore_mem>> -> memref<1x!tpu.dma_semaphore, #tpu.memory_space<semaphore_mem>>
        %35 = tpu.memref_squeeze %34 : memref<1x!tpu.dma_semaphore, #tpu.memory_space<semaphore_mem>> -> memref<!tpu.dma_semaphore, #tpu.memory_space<semaphore_mem>>
        tpu.wait_dma2 semaphore(%35 : memref<!tpu.dma_semaphore, #tpu.memory_space<semaphore_mem>>) src(%32 : memref<2x1x2048xf32, #tpu.memory_space<any>>) dst(%33 : memref<2x1x2048xf32, #tpu.memory_space<any>>)
      } else {
      }
      %23 = arith.index_cast %arg5 : i32 to index
      %24 = memref.load %arg1[%23] : memref<4xi32, #tpu.memory_space<smem>>
      %c0_i32_12 = arith.constant 0 : i32
      %c0_i32_13 = arith.constant 0 : i32
      %25 = tpu.memref_slice %arg2[%c0_i32_12, %24, %c0_i32_13] : memref<2x4x2048xf32, #tpu.memory_space<any>> -> memref<2x1x2048xf32, #tpu.memory_space<any>>
      %c0_i32_14 = arith.constant 0 : i32
      %c0_i32_15 = arith.constant 0 : i32
      %26 = tpu.memref_slice %arg3[%c0_i32_14, %arg5, %c0_i32_15] : memref<2x4x2048xf32, #tpu.memory_space<any>> -> memref<2x1x2048xf32, #tpu.memory_space<any>>
      %27 = tpu.memref_slice %arg4[%19] : memref<2x!tpu.dma_semaphore, #tpu.memory_space<semaphore_mem>> -> memref<1x!tpu.dma_semaphore, #tpu.memory_space<semaphore_mem>>
      %28 = tpu.memref_squeeze %27 : memref<1x!tpu.dma_semaphore, #tpu.memory_space<semaphore_mem>> -> memref<!tpu.dma_semaphore, #tpu.memory_space<semaphore_mem>>
      tpu.enqueue_dma source(%25 : memref<2x1x2048xf32, #tpu.memory_space<any>>) target(%26 : memref<2x1x2048xf32, #tpu.memory_space<any>>) target_semaphore(%28 : memref<!tpu.dma_semaphore, #tpu.memory_space<semaphore_mem>>)
    }
    %c2_i32_1 = arith.constant 2 : i32
    %5 = arith.subi %2, %c2_i32_1 : i32
    %6 = arith.maxsi %0, %5 : i32
    %c0_i32_2 = arith.constant 0 : i32
    %7 = arith.subi %2, %6 : i32
    %8 = arith.addi %6, %7 : i32
    %c1_i32_3 = arith.constant 1 : i32
    scf.for %arg5 = %6 to %8 step %c1_i32_3  : i32 {
      %9 = arith.subi %arg5, %0 : i32
      %c2_i32_4 = arith.constant 2 : i32
      %c0_i32_5 = arith.constant 0 : i32
      %10 = arith.cmpi eq, %c2_i32_4, %c0_i32_5 : i32
      %c1_i32_6 = arith.constant 1 : i32
      %11 = arith.select %10, %c1_i32_6, %c2_i32_4 : i32
      %12 = arith.remsi %9, %11 : i32
      %c0_i32_7 = arith.constant 0 : i32
      %13 = arith.cmpi ne, %12, %c0_i32_7 : i32
      %c0_i32_8 = arith.constant 0 : i32
      %14 = arith.cmpi slt, %12, %c0_i32_8 : i32
      %c0_i32_9 = arith.constant 0 : i32
      %15 = arith.cmpi slt, %11, %c0_i32_9 : i32
      %16 = arith.xori %14, %15 : i1
      %17 = arith.andi %16, %13 : i1
      %18 = arith.addi %12, %11 : i32
      %19 = arith.select %17, %18, %12 : i32
      %20 = arith.index_cast %arg5 : i32 to index
      %21 = memref.load %arg1[%20] : memref<4xi32, #tpu.memory_space<smem>>
      %c0_i32_10 = arith.constant 0 : i32
      %c0_i32_11 = arith.constant 0 : i32
      %22 = tpu.memref_slice %arg2[%c0_i32_10, %21, %c0_i32_11] : memref<2x4x2048xf32, #tpu.memory_space<any>> -> memref<2x1x2048xf32, #tpu.memory_space<any>>
      %c0_i32_12 = arith.constant 0 : i32
      %c0_i32_13 = arith.constant 0 : i32
      %23 = tpu.memref_slice %arg3[%c0_i32_12, %arg5, %c0_i32_13] : memref<2x4x2048xf32, #tpu.memory_space<any>> -> memref<2x1x2048xf32, #tpu.memory_space<any>>
      %24 = tpu.memref_slice %arg4[%19] : memref<2x!tpu.dma_semaphore, #tpu.memory_space<semaphore_mem>> -> memref<1x!tpu.dma_semaphore, #tpu.memory_space<semaphore_mem>>
      %25 = tpu.memref_squeeze %24 : memref<1x!tpu.dma_semaphore, #tpu.memory_space<semaphore_mem>> -> memref<!tpu.dma_semaphore, #tpu.memory_space<semaphore_mem>>
      tpu.wait_dma2 semaphore(%25 : memref<!tpu.dma_semaphore, #tpu.memory_space<semaphore_mem>>) src(%22 : memref<2x1x2048xf32, #tpu.memory_space<any>>) dst(%23 : memref<2x1x2048xf32, #tpu.memory_space<any>>)
    }
    return
  }
}

</mosaic_0001>

<bundles_post_ra>
// kernel: tpu_custom_call.1
= control target key start
LH: loop header
LB: loop body
LE: loop exit
PB: predicated region body
PF: predicated region fallthrough
CT: control target
= control target key end

     0   :  { %s240_s12 = smov [#allocation4]   ;;  %s306_s0 = inlined_call_operand.hbm [shape: s32[4], index: 0, kind: input, shape index: {}]   ;;  %s307_s1 = inlined_call_operand.hbm [shape: f32[2,4,2048], index: 1, kind: input, shape index: {}]   ;;  %s308_s2 = inlined_call_operand.hbm [shape: f32[2,4,2048], index: 2, kind: output, shape index: {}]  }
   0x1   :  { %s8_s11 = sshll.u32 %s306_s0, 4  ;;  %s9_s11 = int_to_ptr.hbm [resolvable:$true] %s8_s11 }
   0x2   :  { %11 = dma.hbm_to_smem %s9_s11, 16, %s240_s12, [#allocation3] }
   0x3   :  { %220 = dma.done.wait [#allocation3], 16 }
   0x4   :  { %221 = vsyncadd [#allocation3], 4294967280 }
   0x5   :  { %14 = sfence }
   0x6   :  { %s263_s13 = smov 0  }
   0x7 LB: > { %s269_s14 = sshll.u32 %s230_s13, 1   ;;  %s230_s13 = sphi %s263_s13, %s20_s13  }
   0x8   : > { %s23_s15 = sadd.s32 2, %s269_s14 }
   0x9   : > { %p24_p0 = scmp.lt.s32.totalorder %s23_s15, 4 }
   0xb   : > { %s311_s15 = smov (!%p24_p0, %s23_s15), 4 }
   0xc   : > { %p137_p1 = scmp.ge.s32.totalorder %s269_s14, %s311_s15 }
   0xd   : > { %s309_s0 = smov (!%p137_p1), %s269_s14 }
   0xe   : > { %138 = sbr.rel (%p137_p1) target bundleno = 47 (0x2f), region = 39 }
  0x13 LB: >> { %s32_s16 = ssub.s32 %s234_s0, %s269_s14  ;;  %s234_s0 = sphi %s309_s0, %s29_s0  }
  0x14   : >> { %p33_p2 = scmp.lt.s32.totalorder %s32_s16, 0  ;;  %s34_s17 = ssub.s32 0, %s32_s16 }
  0x15   : >> { %s152_s18 = smin.u32 %s34_s17, %s32_s16  ;;  %p166_p3 = scmp.ge.s32.totalorder %s32_s16, 2 }
  0x16   : >> { %s36_s19 = sand.u32 1, %s152_s18  }
  0x17   : >> { %s37_s20 = ssub.s32 0, %s36_s19 }
  0x18   : >> { %s313_s20 = smov (!%p33_p2, %s37_s20), %s36_s19 }
  0x19   : >> { %p154_p4 = scmp.lt.s32.totalorder %s313_s20, 0  ;;  %s43_s21 = sadd.s32 2, %s313_s20 }
  0x1b   : >> { %s315_s21 = smov (!%p154_p4, %s43_s21), %s313_s20 }
  0x1c   : >> { %s51_s22 = scalar_lea.sflag [#allocation2], %s315_s21 }
  0x1d   : >> { %223 = dma.done.wait (%p166_p3), %s51_s22, 512 }
  0x1e   : >> { %225 = vsyncadd (%p166_p3), %s51_s22, 4294966784  ;;  %s56_s23 = sld [smem:[#allocation4 + %s234_s0]]  ;;  %s62_s24 = sshrl.u32 %s234_s0, 2 }
  0x1f   : >> { %s241_s25 = smov 64   ;;  %s63_s26 = sand.u32 3, %s234_s0  }
  0x20   : >> { %79 = sst [smem:[#allocation6]] %s241_s25  ;;  %s157_s27 = sshll.u32 %s62_s24, 6 }
  0x21   : >> { %81 = sst [smem:[#allocation6 + $0x1]] %s241_s25  ;;  %s242_s28 = smov 1  }
  0x22   : >> { %83 = sst [smem:[#allocation6 + $0x2]] %s242_s28  ;;  %s65_s29 = sadd.s32 %s157_s27, %s63_s26 }
  0x23   : >> { %s66_s4 = scalar_lea.hbm %s308_s2, %s65_s29  ;;  %s243_s17 = smov [#allocation5]  }
  0x24   : >> { %s74_s5 = sshll.u32 %s66_s4, 4  ;;  %s57_s6 = sshrl.u32 %s56_s23, 2  ;;  %s75_s5 = int_to_ptr.hbm [resolvable:$true] %s74_s5 }
  0x25   : >> { %s58_s7 = sand.u32 3, %s56_s23   ;;  %s156_s8 = sshll.u32 %s57_s6, 6 }
  0x26   : >> { %s60_s9 = sadd.s32 %s156_s8, %s58_s7  ;;  %s244_s18 = smov 0  }
  0x27   : >> { %s61_s12 = scalar_lea.hbm %s307_s1, %s60_s9  ;;  %s29_s0 = sadd.s32 1, %s234_s0  }
  0x28   : >> { %s72_s16 = sshll.u32 %s61_s12, 4  ;;  %p28_p5 = scmp.ge.s32.totalorder %s29_s0, %s311_s15  ;;  %s73_s16 = int_to_ptr.hbm [resolvable:$true] %s72_s16 }
  0x29   : >> { %85 = dma.general %s73_s16, 512, %s75_s5, %s51_s22, %s243_s17, [#allocation6], %s244_s18, 0  }
  0x2a   : > { %31 = sbr.rel (!%p28_p5) target bundleno = 19 (0x13), region = 45 }
  0x2f PF: > { %s158_s19 = sadd.s32 4294967294, %s311_s15 }
  0x30   : > { %p87_p6 = scmp.gt.s32.totalorder %s269_s14, %s158_s19 }
  0x32   : > { %s88_s20 = scalar_select %p87_p6, %s269_s14, %s158_s19  }
  0x34   : > { %p142_p7 = scmp.ge.s32.totalorder %s88_s20, %s311_s15 }
  0x35   : > { %s236_s21 = smov (!%p142_p7), %s88_s20  }
  0x36   : > { %143 = sbr.rel (%p142_p7) target bundleno = 78 (0x4e), region = 50 }
  0x3b LB: >> { %s95_s22 = ssub.s32 %s238_s21, %s269_s14  ;;  %s238_s21 = sphi %s236_s21, %s92_s21  }
  0x3c   : >> { %p96_p8 = scmp.lt.s32.totalorder %s95_s22, 0  ;;  %s97_s23 = ssub.s32 0, %s95_s22 }
  0x3d   : >> { %s159_s0 = smin.u32 %s97_s23, %s95_s22 }
  0x3e   : >> { %s99_s24 = sand.u32 1, %s159_s0  }
  0x3f   : >> { %s100_s25 = ssub.s32 0, %s99_s24 }
  0x40   : >> { %s317_s25 = smov (!%p96_p8, %s100_s25), %s99_s24 }
  0x41   : >> { %p161_p9 = scmp.lt.s32.totalorder %s317_s25, 0  ;;  %s106_s26 = sadd.s32 2, %s317_s25 }
  0x43   : >> { %s319_s26 = smov (!%p161_p9, %s106_s26), %s317_s25 }
  0x44   : >> { %s109_s27 = scalar_lea.sflag [#allocation2], %s319_s26 }
  0x45   : >> { %226 = dma.done.wait %s109_s27, 512 }
  0x46   : >> { %227 = vsyncadd %s109_s27, 4294966784  ;;  %s92_s21 = sadd.s32 1, %s238_s21  }
  0x47   : >> { %p91_p10 = scmp.ge.s32.totalorder %s92_s21, %s311_s15 }
  0x49   : > { %94 = sbr.rel (!%p91_p10) target bundleno = 59 (0x3b), region = 56 }
  0x4e PF: > { %s20_s13 = sadd.s32 1, %s230_s13  }
  0x4f   : > { %p17_p11 = scmp.ge.s32.totalorder %s20_s13, 2  }
  0x51   :  { %19 = sbr.rel (!%p17_p11) target bundleno = 7 (0x7), region = 67 }
  0x56   :  { %114 = vsyncmov [#allocation2] }
  0x59   :  { %s115_s28 = vpop.sfrf %114 }
  0x5a   :  { %p162_p12 = scmp.ne.s32.totalorder %s115_s28, 0 }
  0x5c   :  { %119 = shalt.err (%p162_p12)  }
  0x5d   :  { %121 = vsyncmov [#allocation2 + $0x1] }
  0x60   :  { %s122_s29 = vpop.sfrf %121 }
  0x61   :  { %p163_p13 = scmp.ne.s32.totalorder %s122_s29, 0 }
  0x63   :  { %126 = shalt.err (%p163_p13)  }

</bundles_post_ra>
